<compile_context>
chip_gen: v5e
topology: v5e:2x2
jax: 0.10.0
libtpu: 0.0.40
codegen_flags: <defaults>
</compile_context>

<pallas_src>
import jax
import jax.numpy as jnp
from jax.experimental import pallas as pl
from jax.experimental.pallas import tpu as pltpu


def _round_up(x, m):
    return ((x + m - 1) // m) * m


# ----------------------------------------------------------------------------
# Kernel (transposed, batch-on-lanes layout)
# ----------------------------------------------------------------------------
def dueling_kernel(xt_ref, wft_ref, bf_ref, w1t_ref, b1_ref, w2t_ref, b2_ref,
                   out_ref):
    xt = xt_ref[...]                                       # (n_states, TB) bf16

    # feature^T = ReLU(Wf^T @ x^T + bf)                     (H, TB)  MXU, f32 acc
    feat = jnp.dot(wft_ref[...], xt,
                   preferred_element_type=jnp.float32) + bf_ref[...]
    feat = jnp.maximum(feat, 0.0)

    # Fused hidden layer of BOTH branches:
    #   rows [0:H)   -> advantage1 hidden,  rows [H:2H) -> value1 hidden
    hav = jnp.dot(w1t_ref[...], feat.astype(jnp.bfloat16),
                  preferred_element_type=jnp.float32) + b1_ref[...]
    hav = jnp.maximum(hav, 0.0)                            # (2H, TB) f32

    # Output layer of both heads in ONE MXU pass:
    #   rows [0:A) -> advantage1 (weights zero over the val-hidden half)
    #   row   A    -> value1     (weights zero over the adv-hidden half)
    av = jnp.dot(w2t_ref[...], hav.astype(jnp.bfloat16),
                 preferred_element_type=jnp.float32) + b2_ref[...]   # (A+1, TB)

    n_act = out_ref.shape[0]
    adv = av[:n_act, :]                                    # (A, TB)
    val = av[n_act:n_act + 1, :]                           # (1, TB)

    # dueling combine: value + advantage - mean(advantage); mean = sum * 1/A
    adv_mean = jnp.sum(adv, axis=0, keepdims=True) * (1.0 / n_act)  # sublane reduce
    out_ref[...] = (val + adv - adv_mean).astype(out_ref.dtype)


# ----------------------------------------------------------------------------
# Wrapper
# ----------------------------------------------------------------------------
def _choose_tile(B, tile_b):
    """Batch tile along the 128-lane axis."""
    if B <= 128:
        return B                 # single block; lane dim == full array dim is legal
    tb = _round_up(min(tile_b, _round_up(B, 128)), 128)
    # v7x megacore: keep >= 2 grid steps so ("parallel",) can use both TensorCores.
    if pl.cdiv(B, tb) < 2:
        tb = _round_up(pl.cdiv(B, 2), 128)
    return tb


def dueling_forward(x, pk, *, tile_b=4096):
    """x: (B, n_states) float32.  pk: packed params from pack_params().
    Returns (B, n_actions) float32 Q-values (same semantics as the PyTorch module)."""
    B, n_states = x.shape
    n_actions = pk["b2"].shape[0] - 1

    xt = x.T.astype(jnp.bfloat16)            # (n_states, B): batch on the lane axis
    tb = _choose_tile(B, tile_b)
    grid = (pl.cdiv(B, tb),)

    def resident(arr):
        # Full-array block, constant index_map: DMA'd once, stays VMEM-resident.
        return pl.BlockSpec(arr.shape, lambda i: (0, 0))

    in_specs = [
        pl.BlockSpec((n_states, tb), lambda i: (0, i)),    # x^T tile (pipelined)
        resident(pk["wft"]), resident(pk["bf"]),
        resident(pk["w1t"]), resident(pk["b1"]),
        resident(pk["w2t"]), resident(pk["b2"]),
    ]
    # Lane-dense output slab (n_actions, TB) -> unmasked vector stores.
    out_spec = pl.BlockSpec((n_actions, tb), lambda i: (0, i))

    out_t = pl.pallas_call(
        dueling_kernel,
        out_shape=jax.ShapeDtypeStruct((n_actions, B), jnp.float32),
        grid=grid,
        in_specs=in_specs,
        out_specs=out_spec,
        compiler_params=pltpu.CompilerParams(
            dimension_semantics=("parallel",),   # shard batch tiles across v7x TCs
        ),
    )(xt, pk["wft"], pk["bf"], pk["w1t"], pk["b1"], pk["w2t"], pk["b2"])

    # NOTE: perf-sensitive callers can consume out_t (n_actions, B) directly and
    # skip this transpose; it is only here to match the module's (B, A) layout.
    return out_t.T


# ----------------------------------------------------------------------------
# Parameter construction / packing
# ----------------------------------------------------------------------------
def init_params(key, n_states, n_actions, hidden):
    """Raw fp32 params. Weights stored as (in, out); biases as (1, out)."""
    keys = jax.random.split(key, 10)

    def lin(kw, kb, fan_in, fan_out):
        bound = 1.0 / jnp.sqrt(jnp.float32(fan_in))
        w = jax.random.uniform(kw, (fan_in, fan_out), jnp.float32, -bound, bound)
        b = jax.random.uniform(kb, (1, fan_out), jnp.float32, -bound, bound)
        return w, b

    wf, bf = lin(keys[0], keys[1], n_states, hidden)
    wa1, ba1 = lin(keys[2], keys[3], hidden, hidden)
    wa2, ba2 = lin(keys[4], keys[5], hidden, n_actions)
    wv1, bv1 = lin(keys[6], keys[7], hidden, hidden)
    wv2, bv2 = lin(keys[8], keys[9], hidden, 1)
    return dict(wf=wf, bf=bf, wa1=wa1, ba1=ba1, wa2=wa2, ba2=ba2,
                wv1=wv1, bv1=bv1, wv2=wv2, bv2=bv2)


def pack_params(p, *, matmul_dtype=jnp.bfloat16):
    """Pack & pre-transform raw params once (outside the kernel), transposed layout."""
    f32 = jnp.float32
    H = p["wa1"].shape[0]
    A = p["wa2"].shape[1]

    wft = p["wf"].T                                               # (H, S)
    bf = p["bf"].T.astype(f32)                                    # (H, 1)

    # Fused hidden layer of both branches: (2H, H) / (2H, 1)
    w1t = jnp.concatenate([p["wa1"], p["wv1"]], axis=1).T
    b1 = jnp.concatenate([p["ba1"], p["bv1"]], axis=1).T.astype(f32)

    # Output layer of both heads: (A+1, 2H) / (A+1, 1)
    w2_adv = jnp.concatenate([p["wa2"].T, jnp.zeros((A, H), f32)], axis=1)
    w2_val = jnp.concatenate([jnp.zeros((1, H), f32), p["wv2"].T], axis=1)
    w2t = jnp.concatenate([w2_adv, w2_val], axis=0)
    b2 = jnp.concatenate([p["ba2"], p["bv2"]], axis=1).T.astype(f32)

    return dict(
        wft=wft.astype(matmul_dtype), bf=bf,
        w1t=w1t.astype(matmul_dtype), b1=b1,
        w2t=w2t.astype(matmul_dtype), b2=b2,
    )


# ----------------------------------------------------------------------------
# References
# ----------------------------------------------------------------------------
def reference_forward_fp32(x, p):
    """Pure-JAX fp32 reference of the PyTorch forward semantics (raw params)."""
    feat = jnp.maximum(x @ p["wf"] + p["bf"], 0.0)
    ah = jnp.maximum(feat @ p["wa1"] + p["ba1"], 0.0)
    adv = ah @ p["wa2"] + p["ba2"]
    vh = jnp.maximum(feat @ p["wv1"] + p["bv1"], 0.0)
    val = vh @ p["wv2"] + p["bv2"]
    return val + adv - jnp.mean(adv, axis=-1, keepdims=True)


def reference_forward_faithful(x, pk):
    """Pure-JAX reference mirroring the kernel's exact dtype flow (bf16 operands,
    fp32 accumulation, value head through the bf16 hav path, transposed layout)."""
    f32 = jnp.float32
    A = pk["b2"].shape[0] - 1
    xt = x.T.astype(jnp.bfloat16).astype(f32)
    feat = jnp.maximum(pk["wft"].astype(f32) @ xt + pk["bf"], 0.0)
    fb = feat.astype(jnp.bfloat16).astype(f32)
    hav = jnp.maximum(pk["w1t"].astype(f32) @ fb + pk["b1"], 0.0)
    hb = hav.astype(jnp.bfloat16).astype(f32)
    av = pk["w2t"].astype(f32) @ hb + pk["b2"]
    adv, val = av[:A, :], av[A:A + 1, :]
    q_t = val + adv - jnp.sum(adv, axis=0, keepdims=True) * (1.0 / A)
    return q_t.T


# ----------------------------------------------------------------------------
if __name__ == "__main__":
    n_states, hidden, n_actions = 16, 32, 8

    key = jax.random.PRNGKey(0)
    kx, kp, kx2 = jax.random.split(key, 3)

    raw = init_params(kp, n_states, n_actions, hidden)
    packed = pack_params(raw)

    # Case 1: multi-step pipelined grid (2 batch tiles of 128 lanes each).
    B = 256
    x = jax.random.normal(kx, (B, n_states), jnp.float32)
    out = jax.block_until_ready(dueling_forward(x, packed, tile_b=128))
    assert out.shape == (B, n_actions)
    assert jnp.allclose(out, reference_forward_faithful(x, packed),
                        atol=1e-3, rtol=1e-3), "mismatch vs dtype-faithful reference"
    assert jnp.allclose(out, reference_forward_fp32(x, raw),
                        atol=2e-1, rtol=2e-2), "mismatch vs fp32 module semantics"

    # Case 2: small batch -> single full-extent block (B < 128 lanes).
    B2 = 48
    x2 = jax.random.normal(kx2, (B2, n_states), jnp.float32)
    out2 = jax.block_until_ready(dueling_forward(x2, packed))
    assert out2.shape == (B2, n_actions)
    assert jnp.allclose(out2, reference_forward_faithful(x2, packed),
                        atol=1e-3, rtol=1e-3), "mismatch vs dtype-faithful reference (small B)"
    assert jnp.allclose(out2, reference_forward_fp32(x2, raw),
                        atol=2e-1, rtol=2e-2), "mismatch vs fp32 module semantics (small B)"

    print("KERNEL_OK")
</pallas_src>

<mosaic_0001>
module attributes {stable_mosaic.version = 11 : i64} {
  func.func @dueling_kernel(%arg0: i32, %arg1: memref<16x128xbf16, #tpu.memory_space<vmem>>, %arg2: memref<32x16xbf16, #tpu.memory_space<vmem>>, %arg3: memref<32x1xf32, #tpu.memory_space<vmem>>, %arg4: memref<64x32xbf16, #tpu.memory_space<vmem>>, %arg5: memref<64x1xf32, #tpu.memory_space<vmem>>, %arg6: memref<9x64xbf16, #tpu.memory_space<vmem>>, %arg7: memref<9x1xf32, #tpu.memory_space<vmem>>, %arg8: memref<8x128xf32, #tpu.memory_space<vmem>>) attributes {dimension_semantics = [#tpu.dimension_semantics<parallel>], iteration_bounds = array<i64: 2>, scalar_prefetch = 0 : i64, scratch_operands = 0 : i64, tpu.core_type = #tpu.core_type<tc>, window_params = [{transform_indices = @transform_0, window_bounds = array<i64: 16, 128>}, {pipeline_mode = #tpu.pipeline_mode<synchronous>, transform_indices = @transform_1, window_bounds = array<i64: 32, 16>}, {pipeline_mode = #tpu.pipeline_mode<synchronous>, transform_indices = @transform_2, window_bounds = array<i64: 32, 1>}, {pipeline_mode = #tpu.pipeline_mode<synchronous>, transform_indices = @transform_3, window_bounds = array<i64: 64, 32>}, {pipeline_mode = #tpu.pipeline_mode<synchronous>, transform_indices = @transform_4, window_bounds = array<i64: 64, 1>}, {pipeline_mode = #tpu.pipeline_mode<synchronous>, transform_indices = @transform_5, window_bounds = array<i64: 9, 64>}, {pipeline_mode = #tpu.pipeline_mode<synchronous>, transform_indices = @transform_6, window_bounds = array<i64: 9, 1>}, {transform_indices = @transform_7, window_bounds = array<i64: 8, 128>}]} {
    %c0 = arith.constant 0 : index
    %c0_0 = arith.constant 0 : index
    %0 = vector.load %arg1[%c0, %c0_0] : memref<16x128xbf16, #tpu.memory_space<vmem>>, vector<16x128xbf16>
    %c0_1 = arith.constant 0 : index
    %c0_2 = arith.constant 0 : index
    %1 = vector.load %arg2[%c0_1, %c0_2] : memref<32x16xbf16, #tpu.memory_space<vmem>>, vector<32x16xbf16>
    %cst = arith.constant dense<0.000000e+00> : vector<32x128xf32>
    %2 = tpu.matmul %1, %0, %cst {dimension_numbers = #tpu.dot_dimension_numbers<[1], [0], [0], [1], [0, 0, 1, 1], [], []>} : vector<32x16xbf16>, vector<16x128xbf16>, vector<32x128xf32> -> vector<32x128xf32>
    %c0_3 = arith.constant 0 : index
    %c0_4 = arith.constant 0 : index
    %3 = vector.load %arg3[%c0_3, %c0_4] : memref<32x1xf32, #tpu.memory_space<vmem>>, vector<32x1xf32>
    %4 = vector.broadcast %3 : vector<32x1xf32> to vector<32x128xf32>
    %5 = arith.addf %2, %4 : vector<32x128xf32>
    %cst_5 = arith.constant 0.000000e+00 : f32
    %6 = vector.broadcast %cst_5 : f32 to vector<32x128xf32>
    %7 = arith.maximumf %5, %6 : vector<32x128xf32>
    %c0_6 = arith.constant 0 : index
    %c0_7 = arith.constant 0 : index
    %8 = vector.load %arg4[%c0_6, %c0_7] : memref<64x32xbf16, #tpu.memory_space<vmem>>, vector<64x32xbf16>
    %9 = arith.truncf %7 : vector<32x128xf32> to vector<32x128xbf16>
    %cst_8 = arith.constant dense<0.000000e+00> : vector<64x128xf32>
    %10 = tpu.matmul %8, %9, %cst_8 {dimension_numbers = #tpu.dot_dimension_numbers<[1], [0], [0], [1], [0, 0, 1, 1], [], []>} : vector<64x32xbf16>, vector<32x128xbf16>, vector<64x128xf32> -> vector<64x128xf32>
    %c0_9 = arith.constant 0 : index
    %c0_10 = arith.constant 0 : index
    %11 = vector.load %arg5[%c0_9, %c0_10] : memref<64x1xf32, #tpu.memory_space<vmem>>, vector<64x1xf32>
    %12 = vector.broadcast %11 : vector<64x1xf32> to vector<64x128xf32>
    %13 = arith.addf %10, %12 : vector<64x128xf32>
    %cst_11 = arith.constant 0.000000e+00 : f32
    %14 = vector.broadcast %cst_11 : f32 to vector<64x128xf32>
    %15 = arith.maximumf %13, %14 : vector<64x128xf32>
    %c0_12 = arith.constant 0 : index
    %c0_13 = arith.constant 0 : index
    %16 = vector.load %arg6[%c0_12, %c0_13] : memref<9x64xbf16, #tpu.memory_space<vmem>>, vector<9x64xbf16>
    %17 = arith.truncf %15 : vector<64x128xf32> to vector<64x128xbf16>
    %cst_14 = arith.constant dense<0.000000e+00> : vector<9x128xf32>
    %18 = tpu.matmul %16, %17, %cst_14 {dimension_numbers = #tpu.dot_dimension_numbers<[1], [0], [0], [1], [0, 0, 1, 1], [], []>} : vector<9x64xbf16>, vector<64x128xbf16>, vector<9x128xf32> -> vector<9x128xf32>
    %c0_15 = arith.constant 0 : index
    %c0_16 = arith.constant 0 : index
    %19 = vector.load %arg7[%c0_15, %c0_16] : memref<9x1xf32, #tpu.memory_space<vmem>>, vector<9x1xf32>
    %20 = vector.broadcast %19 : vector<9x1xf32> to vector<9x128xf32>
    %21 = arith.addf %18, %20 : vector<9x128xf32>
    %22 = vector.extract_strided_slice %21 {offsets = [0, 0], sizes = [8, 128], strides = [1, 1]} : vector<9x128xf32> to vector<8x128xf32>
    %23 = vector.extract_strided_slice %21 {offsets = [8, 0], sizes = [1, 128], strides = [1, 1]} : vector<9x128xf32> to vector<1x128xf32>
    %cst_17 = arith.constant dense<0.000000e+00> : vector<128xf32>
    %24 = vector.multi_reduction <add>, %22, %cst_17 [0] : vector<8x128xf32> to vector<128xf32>
    %25 = vector.shape_cast %24 : vector<128xf32> to vector<1x128xf32>
    %cst_18 = arith.constant 1.250000e-01 : f32
    %26 = vector.broadcast %cst_18 : f32 to vector<1x128xf32>
    %27 = arith.mulf %25, %26 : vector<1x128xf32>
    %28 = vector.broadcast %23 : vector<1x128xf32> to vector<8x128xf32>
    %29 = arith.addf %28, %22 : vector<8x128xf32>
    %30 = vector.broadcast %27 : vector<1x128xf32> to vector<8x128xf32>
    %31 = arith.subf %29, %30 : vector<8x128xf32>
    %c0_19 = arith.constant 0 : index
    %c0_20 = arith.constant 0 : index
    %32 = vector.load %arg8[%c0_19, %c0_20] : memref<8x128xf32, #tpu.memory_space<vmem>>, vector<8x128xf32>
    tpu.vector_store %arg8[%c0_19, %c0_20], %31 {strides = array<i32>} : memref<8x128xf32, #tpu.memory_space<vmem>>, vector<8x128xf32>,
    return
  }
  func.func @transform_0(%arg0: i32) -> (i32, i32) {
    %c0_i32 = arith.constant 0 : i32
    %c0_i32_0 = arith.constant 0 : i32
    return %c0_i32, %arg0 : i32, i32
  }
  func.func @transform_1(%arg0: i32) -> (i32, i32) {
    %c0_i32 = arith.constant 0 : i32
    %c0_i32_0 = arith.constant 0 : i32
    %c0_i32_1 = arith.constant 0 : i32
    return %c0_i32, %c0_i32_0 : i32, i32
  }
  func.func @transform_2(%arg0: i32) -> (i32, i32) {
    %c0_i32 = arith.constant 0 : i32
    %c0_i32_0 = arith.constant 0 : i32
    %c0_i32_1 = arith.constant 0 : i32
    return %c0_i32, %c0_i32_0 : i32, i32
  }
  func.func @transform_3(%arg0: i32) -> (i32, i32) {
    %c0_i32 = arith.constant 0 : i32
    %c0_i32_0 = arith.constant 0 : i32
    %c0_i32_1 = arith.constant 0 : i32
    return %c0_i32, %c0_i32_0 : i32, i32
  }
  func.func @transform_4(%arg0: i32) -> (i32, i32) {
    %c0_i32 = arith.constant 0 : i32
    %c0_i32_0 = arith.constant 0 : i32
    %c0_i32_1 = arith.constant 0 : i32
    return %c0_i32, %c0_i32_0 : i32, i32
  }
  func.func @transform_5(%arg0: i32) -> (i32, i32) {
    %c0_i32 = arith.constant 0 : i32
    %c0_i32_0 = arith.constant 0 : i32
    %c0_i32_1 = arith.constant 0 : i32
    return %c0_i32, %c0_i32_0 : i32, i32
  }
  func.func @transform_6(%arg0: i32) -> (i32, i32) {
    %c0_i32 = arith.constant 0 : i32
    %c0_i32_0 = arith.constant 0 : i32
    %c0_i32_1 = arith.constant 0 : i32
    return %c0_i32, %c0_i32_0 : i32, i32
  }
  func.func @transform_7(%arg0: i32) -> (i32, i32) {
    %c0_i32 = arith.constant 0 : i32
    %c0_i32_0 = arith.constant 0 : i32
    return %c0_i32, %arg0 : i32, i32
  }
}

</mosaic_0001>

<bundles_post_ra>
// kernel: tpu_custom_call.1
= control target key start
LH: loop header
LB: loop body
LE: loop exit
PB: predicated region body
PF: predicated region fallthrough
CT: control target
= control target key end

     0   :  { %12 = vsyncpa [#allocation4], 0  ;;  %s1035_s0 = inlined_call_operand.vmem [shape: bf16[16,256], index: 0, kind: input, shape index: {}]   ;;  %s1036_s1 = inlined_call_operand.vmem [shape: bf16[32,16], index: 1, kind: input, shape index: {}]   ;;  %s1037_s2 = inlined_call_operand.vmem [shape: f32[32,1], index: 2, kind: input, shape index: {}]   ;;  %s1038_s3 = inlined_call_operand.vmem [shape: bf16[64,32], index: 3, kind: input, shape index: {}]   ;;  %s1039_s4 = inlined_call_operand.vmem [shape: f32[64,1], index: 4, kind: input, shape index: {}]   ;;  %s1040_s5 = inlined_call_operand.vmem [shape: bf16[9,64], index: 5, kind: input, shape index: {}]   ;;  %s1041_s6 = inlined_call_operand.vmem [shape: f32[9,1], index: 6, kind: input, shape index: {}]   ;;  %s1042_s7 = inlined_call_operand.hbm [shape: f32[8,256], index: 7, kind: output, shape index: {}]  }
   0x1   :  { %14 = vsyncpa [#allocation4 + $0x1], 0  ;;  %s871_s24 = smov 0   ;;  %s873_s25 = smov 0  }
   0x2   :  { %s875_s26 = smov 0   ;;  %s877_s27 = smov 0  }
   0x3 LB: > { %s661_s28 = sadd.s32 4294967295, %s828_s27   ;;  %s662_s29 = sadd.s32 4294967294, %s828_s27   ;;  %s828_s27 = sphi %s877_s27, %s1048_s27   ;;  %s824_s26 = sphi %s875_s26, %s1047_s26   ;;  %s820_s25 = sphi %s873_s25, %s1046_s25   ;;  %s816_s24 = sphi %s871_s24, %s1045_s24  }
   0x4   : > { %s894_s30 = sadd.s32 1, %s828_s27   ;;  %s27_s8 = sadd.s32 1, %s824_s26 }
   0x5   : > { %s24_s9 = ssub.s32 %s828_s27, %s894_s30  ;;  %p34_p0 = scmp.ne.s32.totalorder %s824_s26, %s820_s25 }
   0x6   : > { %p25_p1 = scmp.eq.s32.totalorder %s24_s9, 0  ;;  %p35_p2 = scmp.eq.s32.totalorder %s828_s27, 0 }
   0x7   : > { %p190_p3 = scmp.eq.s32.totalorder %s661_s28, 1  ;;  %p195_p4 = scmp.ne.s32.totalorder %s820_s25, %s816_s24 }
   0x8   : > { %s907_s10 = scalar_select %p25_p1, %s824_s26, %s27_s8  }
   0x9   : > { %p36_p5 = por %p35_p2, %p34_p0  ;;  %p909_p6 = por %p190_p3, %p34_p0 }
   0xa   : > { %p196_p7 = scmp.eq.s32.totalorder %s662_s29, 1  ;;  %p664_p9 = scmp.ge.s32.totalorder %s828_s27, 2 }
   0xc   : > { %p913_p8 = por %p196_p7, %p195_p4  ;;  %230 = sbr.rel (%p664_p9) target bundleno = 23 (0x17), region = 40 }
  0x11   : > { %233 = sbr.rel (!%p36_p5) target bundleno = 23 (0x17), region = 44  ;;  %s235_s13 = sand.u32 (%p36_p5), 1, %s824_s26  }
  0x12   : > { %s666_s14 = sshll.u32 (%p36_p5), %s828_s27, 2  ;;  %s665_s15 = sshll.u32 (%p36_p5), %s235_s13, 3 }
  0x13   : > { %s239_s18 = scalar_lea.vmem (%p36_p5), %s1035_s0, %s666_s14  ;;  %s237_s19 = scalar_lea.vmem (%p36_p5), [#allocation2], %s665_s15 }
  0x14   : > { %v256_v0 = vld [vmem:[%s239_s18] sm:$0xf] (%p36_p5)  ;;  %v258_v1 = vld [vmem:[%s239_s18 + $0x8] sm:$0xf] (%p36_p5) }
  0x15   : > { %257 = vst [vmem:[%s237_s19] sm:$0xf] (%p36_p5), %v256_v0 }
  0x16   : > { %259 = vst [vmem:[%s237_s19 + $0x4] sm:$0xf] %v258_v1 }
  0x17 PF: > { %p667_p10 = scmp.ge.s32.totalorder %s828_s27, 1  ;;  %p286_p11 = scmp.lt.s32.totalorder %s828_s27, 3 }
  0x19   : > { %p287_p12 = pnand %p667_p10, %p286_p11 }
  0x1a   : > { %s293_s22 = sand.u32 (!%p287_p12), 1, %s820_s25   ;;  %s710_s17 = sshll.u32 (!%p287_p12), %s661_s28, 3 }
  0x1b   : > { %290 = sbr.rel (%p287_p12) target bundleno = 531 (0x213), region = 85  ;;  %s936_s8 = sshll.u32 (!%p287_p12), %s293_s22, 3 }
  0x1c   : > { %s295_s9 = scalar_lea.vmem (!%p287_p12), [#allocation2], %s936_s8  ;;  %s592_s20 = scalar_lea.hbm (!%p287_p12), %s1042_s7, %s710_s17 }
  0x1d   : > { %s323_s21 = scalar_lea.vmem (!%p287_p12), [#allocation3], %s936_s8  ;;  %s596_s29 = sshll.u32 (!%p287_p12), %s592_s20, 4  ;;  %s597_s29 = int_to_ptr.hbm [resolvable:$true] %s596_s29 }
  0x1e   : > { %s594_s23 = sshll.u32 (!%p287_p12), %s323_s21, 4  ;;  %s582_s28 = scalar_lea.sflag (!%p287_p12), [#allocation4], %s293_s22  ;;  %s595_s23 = int_to_ptr.vmem [resolvable:$true] %s594_s23 }
  0x1f   : > { %s786_s8 = scalar_lea.hbm (!%p287_p12), %s1042_s7, 16 }
  0x20   : > { %v333_v2 = vld [vmem:[%s1037_s2 + $0x10] sm:$0xff]  ;;  %v331_v3 = vld [vmem:[%s1037_s2] sm:$0xff]  ;;  %v830_v4 = vmov 0   ;;  %vm371_vm0 = vcmask 130048   ;;  %v334_v7 = vld [vmem:[%s1037_s2 + $0x18] sm:$0xff]  ;;  %vm479_vm1 = vcmask 261120  }
  0x21   : > { %763 = vset.pattern.permute.xlu0 %v830_v4  ;;  %764 = vset.pattern.permute.xlu1 %v830_v4  ;;  %v713_v5 = vld [vmem:[%s295_s9] sm:$0xff]  ;;  %v414_v12 = vld [vmem:[%s1039_s4 + $0x18] sm:$0xff]  ;;  %v417_v21 = vld [vmem:[%s1039_s4 + $0x30] sm:$0xff]  ;;  %vm552_vm2 = vcmask 523264   ;;  %s780_s9 = sshra.s32 %s597_s29, 4  ;;  %s781_s9 = int_to_ptr.hbm [resolvable:$true] %s780_s9 }
  0x22   : > { %347 = vperm.xlu0 %763, %v333_v2   ;;  %337 = vperm.xlu1 %764, %v331_v3   ;;  %v714_v6 = vld [vmem:[%s1036_s1] sm:$0xff]  ;;  %v332_v8 = vld [vmem:[%s1037_s2 + $0x8] sm:$0xff]  ;;  %v418_v33 = vld [vmem:[%s1039_s4 + $0x38] sm:$0xff]  ;;  %s782_s13 = scalar_lea.hbm %s781_s9, 8  ;;  %p787_p2 = scmp.lt.s32.totalorder %s781_s9, %s1042_s7 }
  0x23   : > { %765 = vset.pattern.permute.xlu2 %v830_v4  ;;  %385 = vmatpush.bf16.msra.mxu0 %v713_v5  ;;  %v415_v9 = vld [vmem:[%s1039_s4 + $0x20] sm:$0xff]  ;;  %v416_v10 = vld [vmem:[%s1039_s4 + $0x28] sm:$0xff]  ;;  %v718_v37 = vld [vmem:[%s1038_s3 + $0x10] sm:$0xff]  ;;  %p783_p13 = scmp.ne.s32.totalorder %s781_s9, %s782_s13  ;;  %p788_p3 = scmp.lt.s32.totalorder %s786_s8, %s782_s13 }
  0x24   : > { %v715_v11 = vld [vmem:[%s1036_s1 + $0x8] sm:$0xff]  ;;  %v411_v13 = vld [vmem:[%s1039_s4] sm:$0xff]  ;;  %451 = vperm.xlu2 %765, %v417_v21   ;;  %v413_v38 = vld [vmem:[%s1039_s4 + $0x10] sm:$0xff] }
  0x25   : > { %v535_v14 = vld [vmem:[%s1041_s6] sm:$0xff]  ;;  %v536_v15 = vld [vmem:[%s1041_s6 + $0x8] sm:$0x1]  ;;  %v719_v41 = vld [vmem:[%s1038_s3 + $0x18] sm:$0xff]  ;;  %p784_p0 = pnand %p783_p13, %p909_p6  ;;  %p789_p4 = por %p788_p3, %p787_p2 }
  0x26   : > { %682 = vmatmul.msk.bf16.vlgmr.msra.gmra.mxu0 %vm371_vm0, %v714_v6  ;;  %v716_v36 = vld [vmem:[%s1038_s3] sm:$0xff]  ;;  %v412_v39 = vld [vmem:[%s1039_s4 + $0x8] sm:$0xff] }
  0x27   : > { %v717_v40 = vld [vmem:[%s1038_s3 + $0x8] sm:$0xff]  ;;  %p785_p1 = pneg %p784_p0 }
  0x29   : > { %p790_p5 = pnand %p789_p4, %p785_p1 }
  0x2a   : > { %352 = vperm.xlu0 %763, %v334_v7   ;;  %342 = vperm.xlu1 %764, %v332_v8  }
  0x2c   : > { %456 = vperm.xlu2 %765, %v418_v33  }
  0x32   : > { %441 = vperm.xlu0 %763, %v415_v9   ;;  %446 = vperm.xlu1 %764, %v416_v10  }
  0x34   : > { %431 = vperm.xlu2 %765, %v413_v38  }
  0x36   : > { %683 = vmatmul.msk.bf16.gmra.mxu0 %vm371_vm0, %v715_v11 }
  0x3a   : > { %436 = vperm.xlu0 %763, %v414_v12   ;;  %421 = vperm.xlu1 %764, %v411_v13   ;;  %v706_v13 = vld [vmem:[%s1040_s5] sm:$0xf] }
  0x3c   : > { %426 = vperm.xlu2 %765, %v412_v39  }
  0x42   : > { %539 = vperm.xlu0 %763, %v535_v14   ;;  %544 = vperm.xlu1 %764, %v536_v15   ;;  %v720_v14 = vld [vmem:[%s1040_s5] sm:$0x10] }
  0x7e   : > { %v452_v43 = vpop.permute.xlu2 %451 }
  0x86   : > { %v457_v47 = vpop.permute.xlu2 %456 }
  0x8e   : > { %v432_v51 = vpop.permute.xlu2 %431 }
  0x94   : > { %v348_v18 = vpop.permute.xlu0 %347  ;;  %v338_v19 = vpop.permute.xlu1 %337 }
  0x96   : > { %v427_v1 = vpop.permute.xlu2 %426 }
  0x9c   : > { %v353_v22 = vpop.permute.xlu0 %352  ;;  %v343_v24 = vpop.permute.xlu1 %342 }
  0xa3   : > { %v387_v16 = vpop.f32.mrf.mxu0 }
  0xa4   : > { %v388_v28 = vadd.f32 %v387_v16, %v338_v19  ;;  %v442_v50 = vpop.permute.xlu0 %441  ;;  %v447_v53 = vpop.permute.xlu1 %446  ;;  %v707_v16 = vor.u32 %v720_v14, %v706_v13 }
  0xa6   : > { %v397_v34 = vmax.f32 %v388_v28, 0.0 }
  0xab   : > { %v389_v17 = vpop.f32.mrf.mxu0 }
  0xac   : > { %v390_v26 = vadd.f32 %v389_v17, %v343_v24  ;;  %v437_v61 = vpop.permute.xlu0 %436  ;;  %v422_v7 = vpop.permute.xlu1 %421 }
  0xae   : > { %v398_v31 = vmax.f32 %v390_v26, 0.0 }
  0xb0   : > { %v409_v35 = vpack.c.bf16 %v398_v31, %v397_v34 }
  0xb3   : > { %v392_v20 = vpop.f32.mrf.mxu0 }
  0xb4   : > { %v393_v23 = vadd.f32 %v392_v20, %v348_v18  ;;  %v540_v17 = vpop.permute.xlu0 %539 }
  0xb6   : > { %v399_v29 = vmax.f32 %v393_v23, 0.0  ;;  %v545_v23 = vpop.permute.xlu1 %544 }
  0xbb   : > { %v394_v25 = vpop.f32.mrf.mxu0 }
  0xbc   : > { %v395_v27 = vadd.f32 %v394_v25, %v353_v22 }
  0xbe   : > { %v400_v30 = vmax.f32 %v395_v27, 0.0 }
  0xc0   : > { %v410_v32 = vpack.c.bf16 %v400_v30, %v399_v29 }
  0xc2   : > { %498 = vmatpush.bf16.msra.mxu1 %v410_v32  ;;  %721 = vmatpush.bf16.msra.mxu3 %v410_v32 }
  0xc6   : > { %499 = vmatpush.bf16.msra.mxu1 %v409_v35  ;;  %722 = vmatpush.bf16.msra.mxu3 %v409_v35 }
  0xc9   : > { %700 = vmatmul.msk.bf16.vlgmr.msra.gmra.mxu1 %vm479_vm1, %v716_v36  ;;  %702 = vmatmul.msk.bf16.vlgmr.msra.gmra.mxu3 %vm479_vm1, %v718_v37 }
  0xd9   : > { %701 = vmatmul.msk.bf16.gmra.mxu1 %vm479_vm1, %v717_v40  ;;  %703 = vmatmul.msk.bf16.gmra.mxu3 %vm479_vm1, %v719_v41 }
 0x146   : > { %v501_v42 = vpop.f32.mrf.mxu1 }
 0x147   : > { %v502_v8 = vadd.f32 %v501_v42, %v422_v7 }
 0x149   : > { %v521_v12 = vmax.f32 %v502_v8, 0.0 }
 0x14c   : > { %v511_v44 = vpop.f32.mrf.mxu3 }
 0x14d   : > { %v512_v58 = vadd.f32 %v511_v44, %v442_v50 }
 0x14e   : > { %v503_v45 = vpop.f32.mrf.mxu1 }
 0x14f   : > { %v525_v2 = vmax.f32 %v512_v58, 0.0  ;;  %v504_v4 = vadd.f32 %v503_v45, %v427_v1 }
 0x151   : > { %v522_v10 = vmax.f32 %v504_v4, 0.0 }
 0x153   : > { %v531_v15 = vpack.c.bf16 %v522_v10, %v521_v12 }
 0x154   : > { %v513_v46 = vpop.f32.mrf.mxu3 }
 0x155   : > { %v514_v55 = vadd.f32 %v513_v46, %v447_v53 }
 0x156   : > { %v506_v48 = vpop.f32.mrf.mxu1 }
 0x157   : > { %v526_v62 = vmax.f32 %v514_v55, 0.0  ;;  %v507_v3 = vadd.f32 %v506_v48, %v432_v51 }
 0x159   : > { %v533_v6 = vpack.c.bf16 %v526_v62, %v525_v2  ;;  %v523_v9 = vmax.f32 %v507_v3, 0.0 }
 0x15c   : > { %v516_v49 = vpop.f32.mrf.mxu3 }
 0x15d   : > { %v517_v52 = vadd.f32 %v516_v49, %v452_v43 }
 0x15e   : > { %v508_v57 = vpop.f32.mrf.mxu1 }
 0x15f   : > { %v527_v59 = vmax.f32 %v517_v52, 0.0  ;;  %v509_v63 = vadd.f32 %v508_v57, %v437_v61 }
 0x161   : > { %v524_v5 = vmax.f32 %v509_v63, 0.0 }
 0x163   : > { %v532_v11 = vpack.c.bf16 %v524_v5, %v523_v9 }
 0x164   : > { %v518_v54 = vpop.f32.mrf.mxu3 }
 0x165   : > { %v519_v56 = vadd.f32 %v518_v54, %v457_v47 }
 0x167   : > { %v528_v60 = vmax.f32 %v519_v56, 0.0 }
 0x169   : > { %v534_v0 = vpack.c.bf16 %v528_v60, %v527_v59 }
 0x16b   : > { %560 = vmatpush.bf16.msra.mxu2 %v534_v0 }
 0x16f   : > { %561 = vmatpush.bf16.msra.mxu2 %v533_v6 }
 0x173   : > { %562 = vmatpush.bf16.msra.mxu2 %v532_v11 }
 0x177   : > { %563 = vmatpush.bf16.msra.mxu2 %v531_v15 }
 0x17a   : > { %708 = vmatmul.msk.bf16.vlgmr.msra.gmra.mxu2 %vm552_vm2, %v707_v16 }
 0x1fd   : > { %v565_v18 = vpop.f32.mrf.mxu2 }
 0x1fe   : > { %v566_v19 = vadd.f32 %v565_v18, %v540_v17 }
 0x200   : > { %v570_v20 = vrot.slane %v566_v19, 4 }
 0x202   : > { %v571_v21 = vadd.f32 %v570_v20, %v566_v19 }
 0x204   : > { %v572_v22 = vrot.slane %v571_v21, 2 }
 0x205   : > { %v567_v24 = vpop.f32.mrf.mxu2 }
 0x206   : > { %v573_v25 = vadd.f32 %v572_v22, %v571_v21  ;;  %v568_v26 = vadd.f32 %v567_v24, %v545_v23 }
 0x208   : > { %v574_v27 = vrot.slane %v573_v25, 1  ;;  %v577_v28 = vperm.slane %v568_v26, 0 }
 0x20a   : > { %v575_v29 = vadd.f32 %v574_v27, %v573_v25  ;;  %v578_v31 = vadd.f32 %v577_v28, %v566_v19 }
 0x20c   : > { %v576_v30 = vmul.f32 0.125, %v575_v29 }
 0x20e   : > { %v579_v32 = vsub.f32 %v578_v31, %v576_v30 }
 0x210   : > { %580 = vst [vmem:[%s323_s21] sm:$0xff] %v579_v32 }
 0x211   : > { %793 = shalt.err (!%p790_p5)
}
 0x212   : > { %723 = dma.vmem_to_hbm [thread:$0]  (%p909_p6), %s595_s23, 128, %s597_s29, %s582_s28  }
 0x213 PF: > { %s608_s22 = sand.u32 1, %s816_s24   ;;  %p726_p7 = pnand %p664_p9, %p913_p8 }
 0x214   : > { %s609_s18 = scalar_lea.sflag [#allocation4], %s608_s22 }
 0x215   : > { %p727_p10 = pneg %p726_p7 }
 0x217   : > { %811 = dma.done.wait (%p727_p10), %s609_s18, 128  }
 0x218   : > { %813 = vsyncadd (%p727_p10), %s609_s18, 4294967168  ;;  %p17_p11 = scmp.ge.s32.totalorder %s894_s30, 4   ;;  %s1045_s24 = smov %s820_s25 }
 0x219   : > { %s1046_s25 = smov %s824_s26  ;;  %s1047_s26 = smov %s907_s10 }
 0x21a   : > { %s1048_s27 = smov %s894_s30  ;;  %19 = sbr.rel (!%p17_p11) target bundleno = 3 (0x3), region = 129 }
 0x21f   :  { %615 = vsyncpa [#allocation4], 1 }
 0x220   :  { %617 = vsyncpa [#allocation4 + $0x1], 1 }

</bundles_post_ra>
